<compile_context>
chip_gen: v7x
topology: tpu7x:2x2x1
jax: 0.10.0
libtpu: 0.0.40
codegen_flags: <defaults>
</compile_context>

<pallas_src>
import functools

import jax
import jax.numpy as jnp
import numpy as np
from jax.experimental import pallas as pl
from jax.experimental.pallas import tpu as pltpu


def _ctc_greedy_kernel(emission_ref, out_ref, *, blank: int):
    """One sequence per grid step.

    out[t] = argmax(emission[t]) if that index is kept
             (kept = not blank and differs from previous frame's argmax),
             else -1 sentinel.
    Reproduces torch.argmax + torch.unique_consecutive + blank filtering.
    """
    x = emission_ref[0]                        # (T, L) float32
    T, L = x.shape

    # First index achieving the row maximum (matches torch.argmax tie-break).
    col = jax.lax.broadcasted_iota(jnp.int32, (T, L), 1)
    m = jnp.max(x, axis=-1, keepdims=True)
    idx = jnp.min(jnp.where(x == m, col, L), axis=-1, keepdims=True)  # (T, 1)

    # Previous frame's argmax via a cheap 1-lane sublane roll of the index
    # column (row 0 wraps but is masked below).
    prev_idx = pltpu.roll(idx, shift=1, axis=0)                       # (T, 1)

    row = jax.lax.broadcasted_iota(jnp.int32, (T, 1), 0)
    keep = (idx != blank) & ((idx != prev_idx) | (row == 0))

    out_ref[0] = jnp.where(keep, idx, -1)


def greedy_ctc_packed(emissions: jax.Array, blank: int = 0) -> jax.Array:
    """Pallas-accelerated part.

    Args:
      emissions: (B, T, L) float32 logits.
    Returns:
      (B, T, 1) int32: kept label index per frame, or -1 if dropped.
    """
    B, T, L = emissions.shape
    kernel = functools.partial(_ctc_greedy_kernel, blank=blank)
    return pl.pallas_call(
        kernel,
        out_shape=jax.ShapeDtypeStruct((B, T, 1), jnp.int32),
        grid=(B,),
        in_specs=[pl.BlockSpec((1, T, L), lambda b: (b, 0, 0))],
        out_specs=pl.BlockSpec((1, T, 1), lambda b: (b, 0, 0)),
        compiler_params=pltpu.CompilerParams(
            dimension_semantics=("parallel",)),
    )(emissions)


class GreedyCTCDecoder:
    """JAX/Pallas port of the PyTorch GreedyCTCDecoder."""

    def __init__(self, labels, blank: int = 0):
        self.labels = labels
        self.blank = blank

    def __call__(self, emission: jax.Array):
        """Single emission of shape (T, L) -> list of words (PyTorch parity)."""
        return self.decode_batch(emission[None])[0]

    def decode_batch(self, emissions: jax.Array):
        """Batched emissions of shape (B, T, L) -> list of word lists."""
        packed = greedy_ctc_packed(emissions, blank=self.blank)
        # Single host sync + transfer for the whole batch.
        packed_np = jax.device_get(packed)[:, :, 0]
        # TODO(synk): string joining has no Pallas equivalent; done on host.
        results = []
        for seq in packed_np:
            joined = "".join(self.labels[int(i)] for i in seq if i >= 0)
            results.append(joined.replace("|", " ").strip().split())
        return results


def _reference_decode(emission_np, labels, blank=0):
    indices = np.argmax(emission_np, axis=-1)
    dedup = [indices[0]] + [
        indices[t] for t in range(1, len(indices)) if indices[t] != indices[t - 1]
    ]
    dedup = [i for i in dedup if i != blank]
    joined = "".join(labels[int(i)] for i in dedup)
    return joined.replace("|", " ").strip().split()


if __name__ == "__main__":
    # Label set mirroring the torchaudio CTC tutorial ('-' is the blank).
    labels = (
        "-", "|", "e", "t", "a", "o", "n", "i", "h", "s", "r", "d", "l", "u",
        "m", "w", "c", "f", "g", "y", "p", "b", "v", "k", "'", "x", "j", "q", "z",
    )
    batch, num_seq, num_label = 4, 16, len(labels)   # emissions: [B, T, L]

    key = jax.random.PRNGKey(0)
    emissions = jax.random.normal(
        key, (batch, num_seq, num_label), dtype=jnp.float32)

    # Run the kernel once and block on its result.
    packed = greedy_ctc_packed(emissions, blank=0)
    jax.block_until_ready(packed)

    decoder = GreedyCTCDecoder(labels, blank=0)
    transcripts = decoder.decode_batch(emissions)

    # Sanity check against a pure-numpy reference of the PyTorch semantics,
    # including single-sequence __call__ parity.
    emissions_np = np.asarray(emissions)
    for b in range(batch):
        ref = _reference_decode(emissions_np[b], labels, blank=0)
        assert transcripts[b] == ref, (b, transcripts[b], ref)
    assert decoder(emissions[0]) == _reference_decode(
        emissions_np[0], labels, blank=0)

    print("KERNEL_OK")
</pallas_src>

<mosaic_0001>
module attributes {stable_mosaic.version = 11 : i64} {
  func.func @_ctc_greedy_kernel(%arg0: i32, %arg1: memref<1x16x29xf32, #tpu.memory_space<vmem>>, %arg2: memref<1x16x1xi32, #tpu.memory_space<vmem>>) attributes {dimension_semantics = [#tpu.dimension_semantics<parallel>], iteration_bounds = array<i64: 4>, scalar_prefetch = 0 : i64, scratch_operands = 0 : i64, tpu.core_type = #tpu.core_type<tc>, window_params = [{transform_indices = @transform_0, window_bounds = array<i64: 1, 16, 29>}, {transform_indices = @transform_1, window_bounds = array<i64: 1, 16, 1>}]} {
    %c0 = arith.constant 0 : index
    %c0_0 = arith.constant 0 : index
    %c0_1 = arith.constant 0 : index
    %0 = vector.load %arg1[%c0, %c0_0, %c0_1] : memref<1x16x29xf32, #tpu.memory_space<vmem>>, vector<1x16x29xf32>
    %1 = vector.shape_cast %0 : vector<1x16x29xf32> to vector<16x29xf32>
    %2 = tpu.iota {dimensions = array<i32: 1>} : vector<16x29xi32>
    %cst = arith.constant dense<0xFF800000> : vector<16xf32>
    %3 = vector.multi_reduction <maximumf>, %1, %cst [1] : vector<16x29xf32> to vector<16xf32>
    %4 = vector.shape_cast %3 : vector<16xf32> to vector<16x1xf32>
    %5 = vector.broadcast %4 : vector<16x1xf32> to vector<16x29xf32>
    %6 = arith.cmpf oeq, %1, %5 : vector<16x29xf32>
    %c29_i32 = arith.constant 29 : i32
    %7 = vector.broadcast %c29_i32 : i32 to vector<16x29xi32>
    %8 = arith.select %6, %2, %7 : vector<16x29xi1>, vector<16x29xi32>
    %cst_2 = arith.constant dense<2147483647> : vector<16xi32>
    %9 = vector.multi_reduction <minsi>, %8, %cst_2 [1] : vector<16x29xi32> to vector<16xi32>
    %10 = vector.shape_cast %9 : vector<16xi32> to vector<16x1xi32>
    %c1_i32 = arith.constant 1 : i32
    %11 = tpu.dynamic_rotate %10 by %c1_i32 dim 0 : vector<16x1xi32>, i32 -> vector<16x1xi32>
    %12 = tpu.iota {dimensions = array<i32: 0>} : vector<16x1xi32>
    %c0_i32 = arith.constant 0 : i32
    %13 = vector.broadcast %c0_i32 : i32 to vector<16x1xi32>
    %14 = arith.cmpi ne, %10, %13 : vector<16x1xi32>
    %15 = arith.cmpi ne, %10, %11 : vector<16x1xi32>
    %c0_i32_3 = arith.constant 0 : i32
    %16 = vector.broadcast %c0_i32_3 : i32 to vector<16x1xi32>
    %17 = arith.cmpi eq, %12, %16 : vector<16x1xi32>
    %18 = arith.ori %15, %17 : vector<16x1xi1>
    %19 = arith.andi %14, %18 : vector<16x1xi1>
    %c-1_i32 = arith.constant -1 : i32
    %20 = vector.broadcast %c-1_i32 : i32 to vector<16x1xi32>
    %21 = arith.select %19, %10, %20 : vector<16x1xi1>, vector<16x1xi32>
    %c0_4 = arith.constant 0 : index
    %c0_5 = arith.constant 0 : index
    %c0_6 = arith.constant 0 : index
    %22 = vector.load %arg2[%c0_4, %c0_5, %c0_6] : memref<1x16x1xi32, #tpu.memory_space<vmem>>, vector<1x16x1xi32>
    %23 = vector.shape_cast %22 : vector<1x16x1xi32> to vector<16x1xi32>
    %24 = vector.shape_cast %21 : vector<16x1xi32> to vector<1x16x1xi32>
    tpu.vector_store %arg2[%c0_4, %c0_5, %c0_6], %24 {strides = array<i32>} : memref<1x16x1xi32, #tpu.memory_space<vmem>>, vector<1x16x1xi32>,
    return
  }
  func.func @transform_0(%arg0: i32) -> (i32, i32, i32) {
    %c0_i32 = arith.constant 0 : i32
    %c0_i32_0 = arith.constant 0 : i32
    %c0_i32_1 = arith.constant 0 : i32
    return %arg0, %c0_i32, %c0_i32_0 : i32, i32, i32
  }
  func.func @transform_1(%arg0: i32) -> (i32, i32, i32) {
    %c0_i32 = arith.constant 0 : i32
    %c0_i32_0 = arith.constant 0 : i32
    %c0_i32_1 = arith.constant 0 : i32
    return %arg0, %c0_i32, %c0_i32_0 : i32, i32, i32
  }
}

</mosaic_0001>

<bundles_post_ra>
// kernel: tpu_custom_call.1
= control target key start
LH: loop header
LB: loop body
LE: loop exit
PB: predicated region body
PF: predicated region fallthrough
CT: control target
= control target key end

     0   :  { %6 = vsyncpa [#allocation3], 0  ;;  %s518_s0 = inlined_call_operand.hbm [shape: f32[4,16,29], index: 0, kind: input, shape index: {}]   ;;  %s519_s1 = inlined_call_operand.vmem [shape: s32[4,16,1], index: 1, kind: output, shape index: {}]  }
   0x1   :  { %8 = vsyncpa [#allocation3 + $0x1], 0  ;;  %s406_s6 = smov 0   ;;  %s408_s7 = smov 0  }
   0x2   :  { %s410_s8 = smov 0   ;;  %s412_s9 = smov 0  }
   0x3 LB: > { %s425_s10 = sadd.s32 4294967295, %s391_s9   ;;  %s428_s11 = sadd.s32 1, %s391_s9   ;;  %s391_s9 = sphi %s412_s9, %s526_s9   ;;  %s387_s8 = sphi %s410_s8, %s525_s8   ;;  %s383_s7 = sphi %s408_s7, %s524_s7   ;;  %s379_s6 = sphi %s406_s6, %s523_s6  }
   0x4   : > { %s18_s12 = ssub.s32 %s391_s9, %s428_s11  ;;  %s21_s13 = sadd.s32 1, %s387_s8 }
   0x5   : > { %p19_p0 = scmp.eq.s32.totalorder %s18_s12, 0  ;;  %p28_p1 = scmp.ne.s32.totalorder %s387_s8, %s383_s7 }
   0x6   : > { %p29_p2 = scmp.eq.s32.totalorder %s391_s9, 0  ;;  %p34_p3 = scmp.ne.s32.totalorder %s383_s7, %s379_s6 }
   0x7   : > { %s438_s14 = scalar_select %p19_p0, %s387_s8, %s21_s13  }
   0x8   : > { %p30_p4 = por %p29_p2, %p28_p1  ;;  %p35_p5 = scmp.eq.s32.totalorder %s425_s10, 0 }
   0x9   : > { %p292_p6 = scmp.lt.s32.totalorder %s391_s9, 4  ;;  %s84_s16 = sand.u32 1, %s387_s8  }
   0xa   : > { %p442_p7 = por %p35_p5, %p34_p3  ;;  %s275_s17 = sshll.u32 %s84_s16, 4 }
   0xb   : > { %s284_s18 = sshll.u32 %s391_s9, 8  ;;  %s88_s22 = scalar_lea.vmem [#allocation2], %s275_s17 }
   0xc   : > { %s451_s21 = scalar_lea.hbm %s518_s0, %s284_s18  ;;  %s95_s23 = sshll.u32 %s88_s22, 4  ;;  %s453_s23 = int_to_ptr.vmem [resolvable:$true] %s95_s23 }
   0xd   : > { %p455_p8 = pnand %p292_p6, %p30_p4  ;;  %s460_s25 = scalar_lea.sflag [#allocation3], %s84_s16 }
   0xe   : > { %s327_s26 = scalar_lea.hbm %s451_s21, 256  ;;  %s332_s29 = scalar_lea.hbm %s518_s0, 1024 }
   0xf   : > { %p328_p10 = scmp.ne.s32.totalorder %s451_s21, %s327_s26  ;;  %p329_p11 = pneg %p455_p8 }
  0x10   : > { %p333_p0 = scmp.lt.u32.totalorder %s451_s21, %s518_s0  ;;  %p334_p1 = scmp.lt.u32.totalorder %s332_s29, %s327_s26 }
  0x11   : > { %p330_p12 = pnand %p329_p11, %p328_p10  ;;  %p336_p3 = scmp.lt.u32.totalorder %s327_s26, %s451_s21 }
  0x12   : > { %p335_p2 = por %p334_p1, %p333_p0 }
  0x13   : > { %p331_p13 = pneg %p330_p12 }
  0x14   : > { %p337_p4 = por %p336_p3, %p335_p2 }
  0x16   : > { %p338_p5 = pnand %p337_p4, %p331_p13 }
  0x18   : > { %341 = shalt.err (!%p338_p5)
}
  0x19   : > { %s342_s3 = scalar_lea.vmem %s453_s23, 256  ;;  %s393_s4 = smov [#allocation2]  }
  0x1a   : > { %p343_p6 = scmp.ne.s32.totalorder %s453_s23, %s342_s3  ;;  %s347_s5 = sshll.u32 %s393_s4, 4  ;;  %s348_s5 = int_to_ptr.vmem [resolvable:$false] %s347_s5 }
  0x1b   : > { %s349_s6 = scalar_lea.vmem %s348_s5, 512  ;;  %p350_p9 = scmp.lt.s32.totalorder %s453_s23, %s348_s5 }
  0x1c   : > { %p345_p10 = pnand %p343_p6, %p329_p11  ;;  %p351_p0 = scmp.lt.s32.totalorder %s349_s6, %s342_s3 }
  0x1e   : > { %p346_p12 = pneg %p345_p10  ;;  %p352_p1 = por %p351_p0, %p350_p9 }
  0x20   : > { %p353_p2 = pnand %p352_p1, %p346_p12 }
  0x22   : > { %356 = shalt.err (!%p353_p2)
}
  0x23   : > { %s394_s12 = smov 128   ;;  %s395_s13 = smov 8  }
  0x24   : > { %291 = dma.hbm_to_vmem [thread:$0]  (!%p455_p8), %s451_s21, 256, %s453_s23, %s460_s25, %s394_s12, %s394_s12, %s395_s13  }
  0x25   : > { %p103_p11 = scmp.lt.s32.totalorder %s391_s9, 5  ;;  %p522_p13 = scmp.ge.s32.totalorder %s391_s9, 1 }
  0x27   : > { %p104_p3 = pnand %p522_p13, %p103_p11 }
  0x28   : > { %s109_s16 = sand.u32 (!%p104_p3), 1, %s383_s7  }
  0x29   : > { %107 = sbr.rel (%p104_p3) target bundleno = 503 (0x1f7), region = 24  ;;  %s279_s17 = sshll.u32 (!%p104_p3), %s109_s16, 4 }
  0x2a   : > { %s110_s18 = scalar_lea.sflag (!%p104_p3), [#allocation3], %s109_s16  ;;  %s113_s19 = scalar_lea.vmem (!%p104_p3), [#allocation2], %s279_s17 }
  0x30   : > { %374 = dma.done.wait (%p442_p7), %s110_s18, 256  }
  0x31   : > { %376 = vsyncadd (%p442_p7), %s110_s18, 4294967040  ;;  %vm141_vm0 = vcmask 236544   ;;  %v137_v0 = vld [vmem:[%s113_s19] sm:$0xff]  ;;  %v138_v1 = vld [vmem:[%s113_s19 + $0x8] sm:$0xff]  ;;  %v139_v4 = vlaneseq  ;;  %p132_p7 = scmp.lt.s32.totalorder %s425_s10, 3  ;;  %vm202_vm10 = vcmask 7168  }
  0x32   : > { %v142_v2 = vsel %vm141_vm0, %v137_v0, -inf  ;;  %v145_v3 = vsel %vm141_vm0, %v138_v1, -inf }
  0x33   : > { %143 = vmax.xlane.f32.xlu0 %v142_v2  ;;  %v140_v5 = vand.u32 127, %v139_v4  ;;  %v185_v29 = vshrl.u32 %v139_v4, 7  ;;  %s528_s10 = smov (!%p132_p7, %s425_s10), 3 }
  0x34   : > { %s285_s9 = sshll.u32 %s528_s10, 4 }
  0x35   : > { %vm186_vm5 = vcmp.lt.s32.totalorder %v185_v29, 1  ;;  %vm194_vm6 = vcmp.eq.s32.totalorder %v185_v29, 0  ;;  %s136_s21 = scalar_lea.vmem %s519_s1, %s285_s9 }
  0x37   : > { %146 = vmax.xlane.f32.xlu0 %v145_v3 }
  0xc0   : > { %v144_v6 = vpop.xlane.xlu0 %143 }
  0xc1   : > { %vm148_vm1 = vcmp.eq.f32.partialorder %v137_v0, %v144_v6 }
  0xc2   : > { %v150_v7 = vsel %vm148_vm1, %v140_v5, 29 }
  0xc3   : > { %v152_v8 = vsel %vm141_vm0, %v150_v7, 2147483647 }
  0xc4   : > { %v147_v9 = vpop.xlane.xlu0 %146  ;;  %v154_v10 = vshra.s32 %v152_v8, 16  ;;  %v153_v16 = vand.u32 65535, %v152_v8 }
  0xc5   : > { %vm149_vm2 = vcmp.eq.f32.partialorder %v138_v1, %v147_v9 }
  0xc6   : > { %v151_v11 = vsel %vm149_vm2, %v140_v5, 29  ;;  %v156_v12 = vcvt.s32.f32 %v154_v10  ;;  %v155_v18 = vcvt.s32.f32 %v153_v16 }
  0xc7   : > { %v167_v13 = vsel %vm141_vm0, %v151_v11, 2147483647 }
  0xc8   : > { %157 = vmin.xlane.f32.xlu1 %v156_v12  ;;  %v169_v14 = vshra.s32 %v167_v13, 16  ;;  %v168_v19 = vand.u32 65535, %v167_v13 }
  0xca   : > { %v171_v15 = vcvt.s32.f32 %v169_v14  ;;  %v170_v22 = vcvt.s32.f32 %v168_v19 }
  0xcc   : > { %172 = vmin.xlane.f32.xlu1 %v171_v15 }
 0x155   : > { %v158_v17 = vpop.xlane.xlu1 %157 }
 0x156   : > { %vm159_vm3 = vcmp.eq.f32.partialorder %v156_v12, %v158_v17  ;;  %v164_v24 = vcvt.f32.s32 %v158_v17 }
 0x157   : > { %v160_v20 = vsel %vm159_vm3, %v155_v18, inf }
 0x158   : > { %161 = vmin.xlane.f32.xlu0 %v160_v20  ;;  %v165_v28 = vshll.u32 %v164_v24, 16 }
 0x159   : > { %v173_v21 = vpop.xlane.xlu1 %172 }
 0x15a   : > { %vm174_vm4 = vcmp.eq.f32.partialorder %v171_v15, %v173_v21  ;;  %v179_v26 = vcvt.f32.s32 %v173_v21 }
 0x15b   : > { %v175_v23 = vsel %vm174_vm4, %v170_v22, inf }
 0x15c   : > { %176 = vmin.xlane.f32.xlu1 %v175_v23  ;;  %v180_v31 = vshll.u32 %v179_v26, 16 }
 0x1e5   : > { %v162_v25 = vpop.xlane.xlu0 %161 }
 0x1e6   : > { %v163_v27 = vcvt.f32.s32 %v162_v25 }
 0x1e8   : > { %v166_v32 = vadd.s32 %v165_v28, %v163_v27 }
 0x1e9   : > { %v177_v30 = vpop.xlane.xlu1 %176 }
 0x1ea   : > { %v178_v33 = vcvt.f32.s32 %v177_v30  ;;  %v182_v35 = vrot.slane %v166_v32, 7  ;;  %vm190_vm9 = vcmp.ne.s32.totalorder %v166_v32, 0 }
 0x1ec   : > { %v181_v34 = vadd.s32 %v180_v31, %v178_v33 }
 0x1ee   : > { %v183_v36 = vrot.slane %v181_v34, 7  ;;  %vm191_vm12 = vcmp.ne.s32.totalorder %v181_v34, 0 }
 0x1f0   : > { %v187_v37 = vsel %vm186_vm5, %v182_v35, %v183_v36  ;;  %v188_v38 = vsel %vm186_vm5, %v183_v36, %v182_v35 }
 0x1f1   : > { %vm192_vm7 = vcmp.ne.s32.totalorder %v166_v32, %v188_v38  ;;  %vm193_vm8 = vcmp.ne.s32.totalorder %v181_v34, %v187_v37 }
 0x1f2   : > { %vm196_vm11 = vmor %vm192_vm7, %vm194_vm6 }
 0x1f3   : > { %vm198_vm13 = vmand %vm190_vm9, %vm196_vm11 }
 0x1f4   : > { %vm199_vm14 = vmand %vm191_vm12, %vm193_vm8  ;;  %v200_v39 = vsel %vm198_vm13, %v166_v32, 4294967295 }
 0x1f5   : > { %v201_v40 = vsel %vm199_vm14, %v181_v34, 4294967295  ;;  %203 = vst.msk [vmem:[%s136_s21] sm:$0xff] %vm202_vm10, %v200_v39 }
 0x1f6   : > { %204 = vst.msk [vmem:[%s136_s21 + $0x8] sm:$0xff] %vm202_vm10, %v201_v40 }
 0x1f7 PF: > { %p11_p8 = scmp.ge.s32.totalorder %s428_s11, 6   ;;  %s523_s6 = smov %s383_s7 }
 0x1f8   : > { %s524_s7 = smov %s387_s8  ;;  %s525_s8 = smov %s438_s14 }
 0x1f9   : > { %s526_s9 = smov %s428_s11  ;;  %13 = sbr.rel (!%p11_p8) target bundleno = 3 (0x3), region = 64 }
 0x200   :  { %226 = vsyncpa [#allocation3], 1 }
 0x201   :  { %228 = vsyncpa [#allocation3 + $0x1], 1 }

</bundles_post_ra>
